<compile_context>
chip_gen: v6e
topology: v6e:2x2x1
jax: 0.10.0
libtpu: 0.0.40
codegen_flags: <defaults>
</compile_context>

<pallas_src>
import jax
import jax.numpy as jnp
from jax import lax
from jax.experimental import pallas as pl
from jax.experimental.pallas import tpu as pltpu

BN_EPS = 1e-5
VMEM_LIMIT_BYTES = 48 * 1024 * 1024   # explicit scoped-VMEM limit (v5e default is 16 MiB)
VMEM_TILE_BUDGET = 32 * 1024 * 1024   # budget used to size tile_m (safe on v7x's 64 MiB)


def _round_up(x, m):
    return ((x + m - 1) // m) * m


def _derive_tile_k(kp):
    """kp is a multiple of 128; keep a single K strip unless it gets huge."""
    if kp <= 2048:
        return kp
    for tk in (1024, 512, 256, 128):
        if kp % tk == 0:
            return tk
    return kp


def _derive_tile_m(m, tile_k, cp, budget):
    """Size the row tile from a VMEM budget instead of a fixed constant."""
    # Per-row VMEM: double-buffered bf16 LHS tile + double-buffered f32 output
    # tile + f32 accumulator scratch.
    per_row = 2 * tile_k * 2 + 2 * cp * 4 + cp * 4
    resident = 2 * tile_k * cp * 2 + 8 * cp * 4   # weights + packed epilogue params
    avail = max(budget - resident, 8 * per_row)
    t = (avail // per_row) // 8 * 8
    t = min(t, 1024)
    if m >= 16:                                   # expose >=2 grid steps (v7x megacore)
        t = min(t, _round_up(-(-m // 2), 8))
    t = min(t, _round_up(m, 8))
    return max(int(t), 8)


# ---------------------------------------------------------------------------
# Fused kernel: dual-branch conv as one GEMM + folded bias/BN affine + PReLU.
#   grid = (row_tile, k_tile); dimension_semantics = ("parallel", "arbitrary").
# ---------------------------------------------------------------------------
def _conv_bn_prelu_kernel(p_ref, w_ref, par_ref, o_ref, acc_ref):
    k = pl.program_id(1)

    @pl.when(k == 0)
    def _():
        acc_ref[...] = jnp.zeros_like(acc_ref)

    # MXU: bf16 x bf16 -> f32 accumulation
    acc_ref[...] += jnp.dot(p_ref[...], w_ref[...],
                            preferred_element_type=jnp.float32)

    @pl.when(k == pl.num_programs(1) - 1)
    def _():
        scale = par_ref[0:1, :]       # packed [8, CP]: row0=scale, row1=shift, row2=alpha
        shift = par_ref[1:2, :]
        alpha = par_ref[2:3, :]
        z = acc_ref[...] * scale + shift
        o_ref[...] = jnp.where(z > 0, z, alpha * z)


def conv_bn_prelu_pallas(patches, w, par, *, tile_m, tile_k):
    mp, kp = patches.shape
    cp = w.shape[-1]
    grid = (mp // tile_m, kp // tile_k)
    return pl.pallas_call(
        _conv_bn_prelu_kernel,
        out_shape=jax.ShapeDtypeStruct((mp, cp), jnp.float32),
        grid=grid,
        in_specs=[
            pl.BlockSpec((tile_m, tile_k), lambda m, k: (m, k)),
            pl.BlockSpec((tile_k, cp), lambda m, k: (k, 0)),   # weights resident across m
            pl.BlockSpec((8, cp), lambda m, k: (0, 0)),        # packed scale/shift/alpha
        ],
        out_specs=pl.BlockSpec((tile_m, cp), lambda m, k: (m, 0)),
        scratch_shapes=[pltpu.VMEM((tile_m, cp), jnp.float32)],
        compiler_params=pltpu.CompilerParams(
            dimension_semantics=("parallel", "arbitrary"),
            vmem_limit_bytes=VMEM_LIMIT_BYTES),
    )(patches, w, par)


# ---------------------------------------------------------------------------
# Full xModule forward (eval mode). Inputs NCHW f32, outputs NCHW f32.
# ---------------------------------------------------------------------------
def x_module_forward(x_sag, x_cor, params):
    N, C, H, W = x_sag.shape
    kh, kw = params["conv_ker"]
    stride = params["conv_stri"]
    pad = params["pad"]
    C2 = 2 * C                      # per-branch output channels
    C4 = 2 * C2                     # fused output channels (sag ++ cor)
    C3 = 3 * C                      # fused input channels  (x_sag ++ x_cor ++ wsum)
    OH = (H + 2 * pad - kh) // stride + 1
    OW = (W + 2 * pad - kw) // stride + 1
    K = kh * kw * C3
    KP = _round_up(K, 128)                                  # dense LHS lane dim
    CP = _round_up(C4, 256) if C4 > 128 else 128            # 256-wide when it'd be dense

    # ---- layout plumbing (XLA): NCHW -> NHWC, wsum, concat, pad, im2col -----
    xs = jnp.transpose(x_sag, (0, 2, 3, 1))
    xc = jnp.transpose(x_cor, (0, 2, 3, 1))
    q = jnp.transpose(params["Q"], (1, 2, 0))[None]          # [1, H, W, C]
    wsum = xs * q + (1.0 - q) * xc                           # fused by XLA into im2col
    cat3 = jnp.concatenate([xs, xc, wsum], axis=-1)          # [N, H, W, 3C]
    cat3 = jnp.pad(cat3, ((0, 0), (pad, pad), (pad, pad), (0, 0)))
    cols = []
    for dh in range(kh):
        for dw in range(kw):
            cols.append(cat3[:, dh:dh + stride * (OH - 1) + 1:stride,
                                dw:dw + stride * (OW - 1) + 1:stride, :])
    patches = jnp.stack(cols, axis=-2).reshape(N * OH * OW, K)

    M = N * OH * OW
    tile_k = _derive_tile_k(KP)
    tile_m = _derive_tile_m(M, tile_k, CP, VMEM_TILE_BUDGET)
    MP = _round_up(M, tile_m)
    patches = jnp.pad(patches, ((0, MP - M), (0, KP - K))).astype(jnp.bfloat16)

    # ---- fused weight: stack sag/cor along output channels ------------------
    # w_sag inputs = [x_sag (C), wsum (C)]; w_cor inputs = [x_cor (C), wsum (C)]
    w_sag = params["conv_w_sag"]      # HWIO [kh, kw, 2C, 2C]
    w_cor = params["conv_w_cor"]      # HWIO [kh, kw, 2C, 2C]
    w_f = jnp.zeros((kh, kw, C3, C4), jnp.float32)
    w_f = w_f.at[:, :, 0:C, 0:C2].set(w_sag[:, :, 0:C, :])
    w_f = w_f.at[:, :, 2 * C:3 * C, 0:C2].set(w_sag[:, :, C:2 * C, :])
    w_f = w_f.at[:, :, C:2 * C, C2:C4].set(w_cor[:, :, 0:C, :])
    w_f = w_f.at[:, :, 2 * C:3 * C, C2:C4].set(w_cor[:, :, C:2 * C, :])
    w_mat = jnp.pad(w_f.reshape(K, C4),
                    ((0, KP - K), (0, CP - C4))).astype(jnp.bfloat16)

    # ---- fold conv bias + BN into (scale, shift); pack with PReLU alpha -----
    sc, sh, al = [], [], []
    for br in ("sag", "cor"):
        scale = params[f"bn_gamma_{br}"] / jnp.sqrt(params[f"bn_var_{br}"] + BN_EPS)
        shift = params[f"bn_beta_{br}"] + (params[f"conv_b_{br}"]
                                           - params[f"bn_mean_{br}"]) * scale
        sc.append(scale)
        sh.append(shift)
        al.append(jnp.broadcast_to(params[f"prelu_a_{br}"], (C2,)))
    par = jnp.zeros((8, CP), jnp.float32)
    par = par.at[0, :C4].set(jnp.concatenate(sc))
    par = par.at[1, :C4].set(jnp.concatenate(sh))
    par = par.at[2, :C4].set(jnp.concatenate(al))

    # ---- Pallas kernel: fused conv-GEMM + BN + PReLU -------------------------
    out = conv_bn_prelu_pallas(patches, w_mat, par, tile_m=tile_m, tile_k=tile_k)

    # ---- strip padding, split branches, back to NCHW (layout plumbing) ------
    out = out[:M, :C4].reshape(N, OH, OW, C4)
    y_sag = jnp.transpose(out[..., :C2], (0, 3, 1, 2))
    y_cor = jnp.transpose(out[..., C2:], (0, 3, 1, 2))
    return y_sag, y_cor


# ---------------------------------------------------------------------------
# Pure-JAX reference (same eval-mode semantics, same bf16 matmul precision).
# ---------------------------------------------------------------------------
def x_module_reference(x_sag, x_cor, params):
    N, C, H, W = x_sag.shape
    kh, kw = params["conv_ker"]
    stride, pad = params["conv_stri"], params["pad"]
    C2 = 2 * C
    xs = jnp.transpose(x_sag, (0, 2, 3, 1))
    xc = jnp.transpose(x_cor, (0, 2, 3, 1))
    q = jnp.transpose(params["Q"], (1, 2, 0))[None]
    wsum = xs * q + (1.0 - q) * xc

    def branch(x_cat, br):
        z = lax.conv_general_dilated(
            x_cat.astype(jnp.bfloat16),
            params[f"conv_w_{br}"].astype(jnp.bfloat16),
            window_strides=(stride, stride),
            padding=((pad, pad), (pad, pad)),
            dimension_numbers=("NHWC", "HWIO", "NHWC"),
            preferred_element_type=jnp.float32)
        z = z + params[f"conv_b_{br}"]
        scale = params[f"bn_gamma_{br}"] / jnp.sqrt(params[f"bn_var_{br}"] + BN_EPS)
        z = (z - params[f"bn_mean_{br}"]) * scale + params[f"bn_beta_{br}"]
        alpha = jnp.broadcast_to(params[f"prelu_a_{br}"], (C2,))
        y = jnp.where(z > 0, z, alpha * z)
        return jnp.transpose(y, (0, 3, 1, 2))

    return (branch(jnp.concatenate([xs, wsum], -1), "sag"),
            branch(jnp.concatenate([xc, wsum], -1), "cor"))


if __name__ == "__main__":
    # Small shapes consistent with xModule: N=2, C=4, H=W=16;
    # conv: 2C -> 2C, kernel 3, stride 2, pad 1  =>  outputs (N, 2C, H/2, W/2).
    N, C, H, W = 2, 4, 16, 16
    kh = kw = 3
    stride, pad = 2, 1
    C2 = 2 * C

    key = jax.random.PRNGKey(0)
    ks = jax.random.split(key, 17)

    x_sag = jax.random.normal(ks[0], (N, C, H, W), jnp.float32)
    x_cor = jax.random.normal(ks[1], (N, C, H, W), jnp.float32)

    params = {
        "conv_ker": (kh, kw),
        "conv_stri": stride,
        "pad": pad,
        "Q": jax.random.uniform(ks[2], (C, H, W), jnp.float32),  # like torch.rand
    }
    bound = 1.0 / (C2 * kh * kw) ** 0.5
    for i, br in enumerate(("sag", "cor")):
        o = 3 + 7 * i
        params[f"conv_w_{br}"] = jax.random.uniform(
            ks[o + 0], (kh, kw, C2, C2), jnp.float32, -bound, bound)  # HWIO layout
        params[f"conv_b_{br}"] = jax.random.uniform(
            ks[o + 1], (C2,), jnp.float32, -bound, bound)
        params[f"bn_gamma_{br}"] = jax.random.uniform(
            ks[o + 2], (C2,), jnp.float32, 0.5, 1.5)
        params[f"bn_beta_{br}"] = 0.1 * jax.random.normal(ks[o + 3], (C2,), jnp.float32)
        params[f"bn_mean_{br}"] = 0.1 * jax.random.normal(ks[o + 4], (C2,), jnp.float32)
        params[f"bn_var_{br}"] = jax.random.uniform(
            ks[o + 5], (C2,), jnp.float32, 0.5, 1.5)
        params[f"prelu_a_{br}"] = jax.random.uniform(
            ks[o + 6], (C2,), jnp.float32, 0.1, 0.3)

    y_sag, y_cor = x_module_forward(x_sag, x_cor, params)
    y_sag, y_cor = jax.block_until_ready((y_sag, y_cor))

    assert y_sag.shape == (N, C2, H // 2, W // 2)
    assert y_cor.shape == (N, C2, H // 2, W // 2)

    r_sag, r_cor = x_module_reference(x_sag, x_cor, params)
    assert jnp.allclose(y_sag, r_sag, atol=1e-3, rtol=1e-3)
    assert jnp.allclose(y_cor, r_cor, atol=1e-3, rtol=1e-3)

    print("KERNEL_OK")
</pallas_src>

<mosaic_0001>
module attributes {stable_mosaic.version = 11 : i64} {
  func.func @_conv_bn_prelu_kernel(%arg0: i32, %arg1: i32, %arg2: memref<64x128xbf16, #tpu.memory_space<vmem>>, %arg3: memref<128x128xbf16, #tpu.memory_space<vmem>>, %arg4: memref<8x128xf32, #tpu.memory_space<vmem>>, %arg5: memref<64x128xf32, #tpu.memory_space<vmem>>, %arg6: memref<64x128xf32, #tpu.memory_space<vmem>>) attributes {dimension_semantics = [#tpu.dimension_semantics<parallel>, #tpu.dimension_semantics<arbitrary>], iteration_bounds = array<i64: 2, 1>, scalar_prefetch = 0 : i64, scratch_operands = 1 : i64, tpu.core_type = #tpu.core_type<tc>, window_params = [{transform_indices = @transform_0, window_bounds = array<i64: 64, 128>}, {transform_indices = @transform_1, window_bounds = array<i64: 128, 128>}, {pipeline_mode = #tpu.pipeline_mode<synchronous>, transform_indices = @transform_2, window_bounds = array<i64: 8, 128>}, {transform_indices = @transform_3, window_bounds = array<i64: 64, 128>}]} {
    %c0_i32 = arith.constant 0 : i32
    %0 = arith.cmpi eq, %arg1, %c0_i32 : i32
    %1 = arith.extui %0 : i1 to i32
    %c0_i32_0 = arith.constant 0 : i32
    %2 = arith.cmpi ne, %1, %c0_i32_0 : i32
    scf.if %2 {
      %cst_10 = arith.constant 0.000000e+00 : f32
      %12 = vector.broadcast %cst_10 : f32 to vector<64x128xf32>
      %c0_11 = arith.constant 0 : index
      %c0_12 = arith.constant 0 : index
      %13 = vector.load %arg6[%c0_11, %c0_12] : memref<64x128xf32, #tpu.memory_space<vmem>>, vector<64x128xf32>
      tpu.vector_store %arg6[%c0_11, %c0_12], %12 {strides = array<i32>} : memref<64x128xf32, #tpu.memory_space<vmem>>, vector<64x128xf32>,
    } else {
    }
    %c0 = arith.constant 0 : index
    %c0_1 = arith.constant 0 : index
    %3 = vector.load %arg6[%c0, %c0_1] : memref<64x128xf32, #tpu.memory_space<vmem>>, vector<64x128xf32>
    %c0_2 = arith.constant 0 : index
    %c0_3 = arith.constant 0 : index
    %4 = vector.load %arg2[%c0_2, %c0_3] : memref<64x128xbf16, #tpu.memory_space<vmem>>, vector<64x128xbf16>
    %c0_4 = arith.constant 0 : index
    %c0_5 = arith.constant 0 : index
    %5 = vector.load %arg3[%c0_4, %c0_5] : memref<128x128xbf16, #tpu.memory_space<vmem>>, vector<128x128xbf16>
    %cst = arith.constant dense<0.000000e+00> : vector<64x128xf32>
    %6 = tpu.matmul %4, %5, %cst {dimension_numbers = #tpu.dot_dimension_numbers<[1], [0], [0], [1], [0, 0, 1, 1], [], []>} : vector<64x128xbf16>, vector<128x128xbf16>, vector<64x128xf32> -> vector<64x128xf32>
    %7 = arith.addf %3, %6 : vector<64x128xf32>
    %c0_6 = arith.constant 0 : index
    %c0_7 = arith.constant 0 : index
    %8 = vector.load %arg6[%c0_6, %c0_7] : memref<64x128xf32, #tpu.memory_space<vmem>>, vector<64x128xf32>
    tpu.vector_store %arg6[%c0_6, %c0_7], %7 {strides = array<i32>} : memref<64x128xf32, #tpu.memory_space<vmem>>, vector<64x128xf32>,
    %c0_i32_8 = arith.constant 0 : i32
    %9 = arith.cmpi eq, %arg1, %c0_i32_8 : i32
    %10 = arith.extui %9 : i1 to i32
    %c0_i32_9 = arith.constant 0 : i32
    %11 = arith.cmpi ne, %10, %c0_i32_9 : i32
    scf.if %11 {
      %c0_10 = arith.constant 0 : index
      %c0_11 = arith.constant 0 : index
      %12 = vector.load %arg4[%c0_10, %c0_11] : memref<8x128xf32, #tpu.memory_space<vmem>>, vector<1x128xf32>
      %c1 = arith.constant 1 : index
      %c0_12 = arith.constant 0 : index
      %13 = vector.load %arg4[%c1, %c0_12] : memref<8x128xf32, #tpu.memory_space<vmem>>, vector<1x128xf32>
      %c2 = arith.constant 2 : index
      %c0_13 = arith.constant 0 : index
      %14 = vector.load %arg4[%c2, %c0_13] : memref<8x128xf32, #tpu.memory_space<vmem>>, vector<1x128xf32>
      %c0_14 = arith.constant 0 : index
      %c0_15 = arith.constant 0 : index
      %15 = vector.load %arg6[%c0_14, %c0_15] : memref<64x128xf32, #tpu.memory_space<vmem>>, vector<64x128xf32>
      %16 = vector.broadcast %12 : vector<1x128xf32> to vector<64x128xf32>
      %17 = arith.mulf %15, %16 : vector<64x128xf32>
      %18 = vector.broadcast %13 : vector<1x128xf32> to vector<64x128xf32>
      %19 = arith.addf %17, %18 : vector<64x128xf32>
      %cst_16 = arith.constant 0.000000e+00 : f32
      %20 = vector.broadcast %cst_16 : f32 to vector<64x128xf32>
      %21 = arith.cmpf ogt, %19, %20 : vector<64x128xf32>
      %22 = vector.broadcast %14 : vector<1x128xf32> to vector<64x128xf32>
      %23 = arith.mulf %22, %19 : vector<64x128xf32>
      %24 = arith.select %21, %19, %23 : vector<64x128xi1>, vector<64x128xf32>
      %c0_17 = arith.constant 0 : index
      %c0_18 = arith.constant 0 : index
      %25 = vector.load %arg5[%c0_17, %c0_18] : memref<64x128xf32, #tpu.memory_space<vmem>>, vector<64x128xf32>
      tpu.vector_store %arg5[%c0_17, %c0_18], %24 {strides = array<i32>} : memref<64x128xf32, #tpu.memory_space<vmem>>, vector<64x128xf32>,
    } else {
    }
    return
  }
  func.func @transform_0(%arg0: i32, %arg1: i32) -> (i32, i32) {
    %c0_i32 = arith.constant 0 : i32
    return %arg0, %arg1 : i32, i32
  }
  func.func @transform_1(%arg0: i32, %arg1: i32) -> (i32, i32) {
    %c0_i32 = arith.constant 0 : i32
    %c0_i32_0 = arith.constant 0 : i32
    return %arg1, %c0_i32 : i32, i32
  }
  func.func @transform_2(%arg0: i32, %arg1: i32) -> (i32, i32) {
    %c0_i32 = arith.constant 0 : i32
    %c0_i32_0 = arith.constant 0 : i32
    %c0_i32_1 = arith.constant 0 : i32
    return %c0_i32, %c0_i32_0 : i32, i32
  }
  func.func @transform_3(%arg0: i32, %arg1: i32) -> (i32, i32) {
    %c0_i32 = arith.constant 0 : i32
    %c0_i32_0 = arith.constant 0 : i32
    return %arg0, %c0_i32 : i32, i32
  }
}

</mosaic_0001>

<bundles_post_ra>
// kernel: tpu_custom_call.1
= control target key start
LH: loop header
LB: loop body
LE: loop exit
PB: predicated region body
PF: predicated region fallthrough
CT: control target
= control target key end

     0   :  { %8 = vsyncpa [#allocation4], 0  ;;  %s1225_s0 = inlined_call_operand.hbm [shape: bf16[128,128], index: 0, kind: input, shape index: {}]   ;;  %s1226_s1 = inlined_call_operand.hbm [shape: bf16[128,128], index: 1, kind: input, shape index: {}]   ;;  %s1227_s2 = inlined_call_operand.hbm [shape: f32[8,128], index: 2, kind: input, shape index: {}]   ;;  %s1228_s3 = inlined_call_operand.hbm [shape: f32[128,128], index: 3, kind: output, shape index: {}]  }
   0x1   :  { %10 = vsyncpa [#allocation4 + $0x1], 0 }
   0x2   :  { %11 = vsyncpa [#allocation7], 0 }
   0x3   :  { %12 = vsyncpa [#allocation5], 0 }
   0x4   :  { %14 = vsyncpa [#allocation5 + $0x1], 0  ;;  %s1013_s12 = smov 0   ;;  %s1015_s13 = smov 0  }
   0x5   :  { %s1017_s14 = smov 0   ;;  %s1019_s15 = smov 0  }
   0x6   :  { %s1021_s16 = smov 0   ;;  %s1023_s17 = smov 0  }
   0x7 LB: > { %s632_s18 = sadd.s32 4294967295, %s983_s17   ;;  %s633_s19 = sadd.s32 4294967294, %s983_s17   ;;  %s983_s17 = sphi %s1023_s17, %s20_s17   ;;  %s979_s16 = sphi %s1021_s16, %s1245_s16   ;;  %s975_s15 = sphi %s1019_s15, %s1244_s15   ;;  %s971_s14 = sphi %s1017_s14, %s1243_s14   ;;  %s967_s13 = sphi %s1015_s13, %s1242_s13   ;;  %s963_s12 = sphi %s1013_s12, %s1241_s12  }
   0x8   : > { %p54_p0 = scmp.ne.s32.totalorder %s967_s13, %s963_s12  ;;  %p1047_p1 = scmp.eq.s32.totalorder %s632_s18, 0 }
   0x9   : > { %p1051_p2 = scmp.eq.s32.totalorder %s632_s18, 1  ;;  %p131_p3 = scmp.eq.s32.totalorder %s633_s19, 1 }
   0xa   : > { %p1057_p4 = por %p1047_p1, %p54_p0  ;;  %p634_p5 = scmp.ge.s32.totalorder %s983_s17, 1 }
   0xb   : > { %p1062_p6 = por %p131_p3, %p54_p0  ;;  %p138_p7 = scmp.lt.s32.totalorder %s983_s17, 3 }
   0xc   : > { %s985_s25 = smov [#allocation6]   ;;  %s986_s28 = smov [#allocation8]  }
   0xd   : > { %s1233_s23 = scalar_select %p1062_p6, 1, 0 }
   0xe   : > { %p1067_p8 = pnand %p634_p5, %p138_p7  ;;  %s153_s26 = sshll.u32 %s985_s25, 4  ;;  %s154_s26 = int_to_ptr.vmem [resolvable:$true] %s153_s26 }
   0xf   : > { %s167_s29 = sshll.u32 %s986_s28, 4  ;;  %s830_s30 = scalar_lea.vmem %s154_s26, 1024  ;;  %s168_s29 = int_to_ptr.vmem [resolvable:$true] %s167_s29 }
  0x10   : > { %p732_p9 = pneg %p1067_p8  ;;  %p831_p13 = scmp.ne.s32.totalorder %s154_s26, %s830_s30 }
  0x11   : > { %p838_p5 = scmp.lt.s32.totalorder %s154_s26, %s154_s26  ;;  %p839_p7 = scmp.lt.s32.totalorder %s830_s30, %s830_s30 }
  0x12   : > { %p1076_p11 = pnand %p732_p9, %p1047_p1 }
  0x13   : > { %p840_p10 = por %p839_p7, %p838_p5 }
  0x14   : > { %p821_p12 = pneg %p1076_p11 }
  0x16   : > { %p833_p0 = pnand %p831_p13, %p821_p12 }
  0x18   : > { %p834_p3 = pneg %p833_p0 }
  0x1a   : > { %p841_p9 = pnand %p840_p10, %p834_p3 }
  0x1c   : > { %844 = shalt.err (!%p841_p9)
}
  0x1d   : > { %s1229_s4 = smov 64   ;;  %s988_s5 = smov 4  }
  0x1e   : > { %735 = dma.hbm_to_vmem [thread:$0]  (!%p1076_p11), %s1226_s1, 1024, %s154_s26, [#allocation7], %s1229_s4, %s1229_s4, %s988_s5  }
  0x1f   : > { %s856_s8 = scalar_lea.vmem %s168_s29, 128  ;;  %p864_p10 = scmp.lt.s32.totalorder %s168_s29, %s168_s29 }
  0x20   : > { %p857_p13 = scmp.ne.s32.totalorder %s168_s29, %s856_s8  ;;  %p865_p3 = scmp.lt.s32.totalorder %s856_s8, %s856_s8 }
  0x22   : > { %p859_p0 = pnand %p857_p13, %p821_p12  ;;  %p866_p7 = por %p865_p3, %p864_p10 }
  0x24   : > { %p860_p5 = pneg %p859_p0 }
  0x26   : > { %p867_p9 = pnand %p866_p7, %p860_p5 }
  0x28   : > { %870 = shalt.err (!%p867_p9)
}
  0x29   : > { %738 = dma.hbm_to_vmem [thread:$0]  (!%p1076_p11), %s1227_s2, 128, %s168_s29, [#allocation7]  }
  0x2a   : > { %s32_s11 = sadd.s32 1, %s979_s16  ;;  %s41_s18 = sadd.s32 1, %s971_s14 }
  0x2b   : > { %p34_p12 = scmp.ge.s32.totalorder %s32_s11, 2  ;;  %p48_p13 = scmp.ne.s32.totalorder %s971_s14, %s967_s13 }
  0x2c   : > { %p49_p0 = scmp.eq.s32.totalorder %s983_s17, 0  ;;  %p749_p5 = scmp.lt.s32.totalorder %s983_s17, 2 }
  0x2d   : > { %s1247_s11 = smov (%p34_p12, %s32_s11), 0  ;;  %p1111_p3 = por %p1051_p2, %p48_p13 }
  0x2e   : > { %p50_p10 = por %p49_p0, %p48_p13  ;;  %s36_s25 = ssub.s32 %s979_s16, %s1247_s11 }
  0x2f   : > { %s178_s26 = sand.u32 1, %s971_s14   ;;  %p39_p7 = scmp.eq.s32.totalorder %s36_s25, 0 }
  0x30   : > { %s638_s27 = sshll.u32 %s178_s26, 5  ;;  %s666_s28 = sshll.u32 %s979_s16, 9 }
  0x31   : > { %s1120_s29 = scalar_select %p39_p7, %s971_s14, %s41_s18  }
  0x32   : > { %s189_s7 = scalar_lea.hbm %s1225_s0, %s666_s28  ;;  %s182_s8 = scalar_lea.vmem [#allocation3], %s638_s27 }
  0x33   : > { %s190_s9 = sshll.u32 %s182_s8, 4  ;;  %p1127_p11 = pnand %p749_p5, %p50_p10  ;;  %s191_s9 = int_to_ptr.vmem [resolvable:$true] %s190_s9 }
  0x34   : > { %s179_s10 = scalar_lea.sflag [#allocation4], %s178_s26  ;;  %s884_s25 = scalar_lea.vmem %s191_s9, 512 }
  0x35   : > { %p873_p2 = pneg %p1127_p11  ;;  %p885_p9 = scmp.ne.s32.totalorder %s191_s9, %s884_s25 }
  0x36   : > { %s989_s18 = smov [#allocation3]  }
  0x37   : > { %p887_p12 = pnand %p885_p9, %p873_p2  ;;  %s889_s4 = sshll.u32 %s989_s18, 4  ;;  %s890_s4 = int_to_ptr.vmem [resolvable:$false] %s889_s4 }
  0x38   : > { %s891_s28 = scalar_lea.vmem %s890_s4, 1024  ;;  %p892_p0 = scmp.lt.s32.totalorder %s191_s9, %s890_s4 }
  0x39   : > { %p888_p13 = pneg %p887_p12  ;;  %p893_p7 = scmp.lt.s32.totalorder %s891_s28, %s884_s25 }
  0x3b   : > { %p894_p6 = por %p893_p7, %p892_p0 }
  0x3d   : > { %p895_p5 = pnand %p894_p6, %p888_p13 }
  0x3f   : > { %898 = shalt.err (!%p895_p5)
}
  0x40   : > { %s1238_s27 = smov 64   ;;  %202 = sbr.rel (%p1067_p8) target bundleno = 326 (0x146), region = 32 }
  0x41   : > { %742 = dma.hbm_to_vmem [thread:$0]  (!%p1127_p11), %s189_s7, 512, %s191_s9, %s179_s10, %s1238_s27, %s1238_s27, %s988_s5  }
  0x42   : > { %s1141_s26 = sand.u32 (!%p1067_p8), 1, %s967_s13  }
  0x43   : > { %s642_s4 = sshll.u32 (!%p1067_p8), %s1141_s26, 5  ;;  %s205_s30 = scalar_lea.sflag (!%p1067_p8), [#allocation4], %s1141_s26 }
  0x44   : > { %s1145_s6 = scalar_lea.vmem (!%p1067_p8), [#allocation3], %s642_s4 }
  0x45   : > { %950 = dma.done.wait (%p1057_p4), %s205_s30, 512  }
  0x46   : > { %952 = vsyncadd (%p1057_p4), %s205_s30, 4294966784 }
  0x47   : > { %954 = dma.done.wait (%p1047_p1), [#allocation7], 1152  }
  0x48   : > { %956 = vsyncadd (%p1047_p1), [#allocation7], 4294966144  ;;  %v807_v0 = vld [vmem:[#allocation6 + $0x38] sm:$0xff]   ;;  %v808_v1 = vld [vmem:[#allocation6 + $0x30] sm:$0xff]   ;;  %s645_s20 = sshll.u32 %s1141_s26, 6  ;;  %s667_s24 = sshll.u32 %s975_s15, 10 }
  0x49   : > { %680 = vmatprep.subr.bf16.mxu0 %v807_v0  ;;  %704 = vmatprep.subr.bf16.mxu1 %v807_v0  ;;  %v809_v2 = vld [vmem:[#allocation6 + $0x28] sm:$0xff]   ;;  %v810_v3 = vld [vmem:[#allocation6 + $0x20] sm:$0xff]   ;;  %v816_v5 = vld [vmem:[%s1145_s6 + $0x10] sm:$0xff]   ;;  %s1160_s22 = scalar_lea.vmem [#allocation9], %s645_s20  ;;  %s1171_s8 = scalar_lea.hbm %s1228_s3, %s667_s24 }
  0x4a   : > { %681 = vmatpush3.bf16.msra.mxu0 %v807_v0  ;;  %712 = vmatpush3.bf16.msra.mxu1 %v807_v0  ;;  %v815_v4 = vld [vmem:[%s1145_s6] sm:$0xff]   ;;  %v811_v6 = vld [vmem:[#allocation6 + $0x18] sm:$0xff]   ;;  %v812_v7 = vld [vmem:[#allocation6 + $0x10] sm:$0xff]   ;;  %s528_s5 = sshll.u32 %s1160_s22, 4  ;;  %s515_s9 = scalar_lea.sflag [#allocation5], %s1141_s26  ;;  %s1173_s5 = int_to_ptr.vmem [resolvable:$true] %s528_s5 }
  0x4b   : > { %682 = vmatprep.subr.bf16.mxu0 %v808_v1  ;;  %705 = vmatprep.subr.bf16.mxu1 %v808_v1  ;;  %v813_v8 = vld [vmem:[#allocation6 + $0x8] sm:$0xff]   ;;  %v814_v9 = vld [vmem:[#allocation6] sm:$0xff]   ;;  %v818_v11 = vld [vmem:[%s1145_s6 + $0x18] sm:$0xff]   ;;  %s899_s21 = scalar_lea.vmem %s1173_s5, 1024  ;;  %s990_s10 = smov [#allocation9]  }
  0x4c   : > { %696 = vmatprep.mubr.bf16.mxu0 %v815_v4  ;;  %700 = vmatprep.mubr.bf16.mxu1 %v816_v5  ;;  %v817_v10 = vld [vmem:[%s1145_s6 + $0x8] sm:$0xff]   ;;  %v658_v12 = vld [vmem:[#allocation8] ss:$0 sm:$0xff]  ;;  %v659_v14 = vld [vmem:[#allocation8 + $0x1] ss:$0 sm:$0xff]  ;;  %p900_p1 = scmp.ne.s32.totalorder %s1173_s5, %s899_s21  ;;  %s903_s25 = sshll.u32 %s990_s10, 4  ;;  %s904_s25 = int_to_ptr.vmem [resolvable:$false] %s903_s25 }
  0x4d   : > { %v660_v18 = vld [vmem:[#allocation8 + $0x2] ss:$0 sm:$0xff]  ;;  %s905_s18 = scalar_lea.vmem %s904_s25, 2048  ;;  %p906_p8 = scmp.lt.s32.totalorder %s1173_s5, %s904_s25 }
  0x4e   : > { %683 = vmatpush3.bf16.msra.mxu0 %v808_v1  ;;  %713 = vmatpush3.bf16.msra.mxu1 %v808_v1  ;;  %p901_p4 = pnand %p900_p1, %p1111_p3  ;;  %p907_p10 = scmp.lt.s32.totalorder %s905_s18, %s899_s21 }
  0x4f   : > { %684 = vmatprep.subr.bf16.mxu0 %v809_v2  ;;  %706 = vmatprep.subr.bf16.mxu1 %v809_v2 }
  0x50   : > { %p902_p6 = pneg %p901_p4  ;;  %p908_p11 = por %p907_p10, %p906_p8 }
  0x52   : > { %685 = vmatpush3.bf16.msra.mxu0 %v809_v2  ;;  %714 = vmatpush3.bf16.msra.mxu1 %v809_v2  ;;  %p909_p2 = pnand %p908_p11, %p902_p6 }
  0x53   : > { %686 = vmatprep.subr.bf16.mxu0 %v810_v3  ;;  %707 = vmatprep.subr.bf16.mxu1 %v810_v3 }
  0x56   : > { %687 = vmatpush3.bf16.msra.mxu0 %v810_v3  ;;  %715 = vmatpush3.bf16.msra.mxu1 %v810_v3 }
  0x57   : > { %688 = vmatprep.subr.bf16.mxu0 %v811_v6  ;;  %708 = vmatprep.subr.bf16.mxu1 %v811_v6 }
  0x5a   : > { %689 = vmatpush3.bf16.msra.mxu0 %v811_v6  ;;  %716 = vmatpush3.bf16.msra.mxu1 %v811_v6 }
  0x5b   : > { %690 = vmatprep.subr.bf16.mxu0 %v812_v7  ;;  %709 = vmatprep.subr.bf16.mxu1 %v812_v7 }
  0x5e   : > { %691 = vmatpush3.bf16.msra.mxu0 %v812_v7  ;;  %717 = vmatpush3.bf16.msra.mxu1 %v812_v7 }
  0x5f   : > { %692 = vmatprep.subr.bf16.mxu0 %v813_v8  ;;  %710 = vmatprep.subr.bf16.mxu1 %v813_v8 }
  0x62   : > { %693 = vmatpush3.bf16.msra.mxu0 %v813_v8  ;;  %718 = vmatpush3.bf16.msra.mxu1 %v813_v8 }
  0x63   : > { %694 = vmatprep.subr.bf16.mxu0 %v814_v9  ;;  %711 = vmatprep.subr.bf16.mxu1 %v814_v9 }
  0x66   : > { %695 = vmatpush3.bf16.msra.mxu0 %v814_v9  ;;  %719 = vmatpush3.bf16.msra.mxu1 %v814_v9 }
  0x69   : > { %697 = vmatmul.mubr.bf16.vlgmr.msra.gmra.mxu0 %v817_v10  ;;  %701 = vmatmul.mubr.bf16.vlgmr.msra.gmra.mxu1 %v818_v11 }
 0x129   : > { %v698_v13 = vpop.f32.mrf.mxu0  ;;  %v702_v15 = vpop.f32.mrf.mxu1 }
 0x12a   : > { %v460_v16 = vmul.f32 %v698_v13, %v658_v12  ;;  %v464_v17 = vmul.f32 %v702_v15, %v658_v12 }
 0x12b   : > { %v393_v19 = vpop.f32.mrf.mxu0  ;;  %v409_v20 = vpop.f32.mrf.mxu1 }
 0x12c   : > { %v472_v21 = vadd.f32 %v659_v14, %v460_v16  ;;  %v476_v22 = vadd.f32 %v659_v14, %v464_v17  ;;  %v458_v23 = vmul.f32 %v658_v12, %v393_v19  ;;  %v462_v24 = vmul.f32 %v658_v12, %v409_v20 }
 0x12d   : > { %v699_v25 = vpop.f32.mrf.mxu0  ;;  %v703_v26 = vpop.f32.mrf.mxu1 }
 0x12e   : > { %vm480_vm0 = vcmp.gt.f32.partialorder %v472_v21, 0.0  ;;  %v492_v27 = vmul.f32 %v660_v18, %v472_v21  ;;  %vm484_vm1 = vcmp.gt.f32.partialorder %v476_v22, 0.0  ;;  %v496_v28 = vmul.f32 %v660_v18, %v476_v22 }
 0x12f   : > { %v470_v29 = vadd.f32 %v659_v14, %v458_v23  ;;  %v474_v30 = vadd.f32 %v659_v14, %v462_v24  ;;  %v461_v31 = vmul.f32 %v699_v25, %v658_v12  ;;  %v465_v32 = vmul.f32 %v703_v26, %v658_v12  ;;  %v396_v33 = vpop.f32.mrf.mxu0  ;;  %v412_v34 = vpop.f32.mrf.mxu1 }
 0x130   : > { %v500_v35 = vsel %vm480_vm0, %v472_v21, %v492_v27  ;;  %v504_v36 = vsel %vm484_vm1, %v476_v22, %v496_v28  ;;  %v459_v37 = vmul.f32 %v658_v12, %v396_v33  ;;  %v463_v38 = vmul.f32 %v658_v12, %v412_v34 }
 0x131   : > { %508 = vst [vmem:[%s1160_s22 + $0x10] sm:$0xff] %v500_v35  ;;  %512 = vst [vmem:[%s1160_s22 + $0x30] sm:$0xff] %v504_v36  ;;  %vm478_vm2 = vcmp.gt.f32.partialorder %v470_v29, 0.0  ;;  %v490_v39 = vmul.f32 %v660_v18, %v470_v29  ;;  %vm482_vm3 = vcmp.gt.f32.partialorder %v474_v30, 0.0  ;;  %v494_v40 = vmul.f32 %v660_v18, %v474_v30 }
 0x132   : > { %v473_v41 = vadd.f32 %v659_v14, %v461_v31  ;;  %v477_v42 = vadd.f32 %v659_v14, %v465_v32  ;;  %v471_v43 = vadd.f32 %v659_v14, %v459_v37  ;;  %v475_v44 = vadd.f32 %v659_v14, %v463_v38 }
 0x133   : > { %v498_v45 = vsel %vm478_vm2, %v470_v29, %v490_v39  ;;  %v502_v46 = vsel %vm482_vm3, %v474_v30, %v494_v40 }
 0x134   : > { %506 = vst [vmem:[%s1160_s22] sm:$0xff] %v498_v45  ;;  %510 = vst [vmem:[%s1160_s22 + $0x20] sm:$0xff] %v502_v46  ;;  %vm481_vm4 = vcmp.gt.f32.partialorder %v473_v41, 0.0  ;;  %v493_v47 = vmul.f32 %v660_v18, %v473_v41  ;;  %vm485_vm5 = vcmp.gt.f32.partialorder %v477_v42, 0.0  ;;  %v497_v48 = vmul.f32 %v660_v18, %v477_v42 }
 0x135   : > { %vm479_vm6 = vcmp.gt.f32.partialorder %v471_v43, 0.0  ;;  %v491_v49 = vmul.f32 %v660_v18, %v471_v43  ;;  %vm483_vm7 = vcmp.gt.f32.partialorder %v475_v44, 0.0  ;;  %v495_v50 = vmul.f32 %v660_v18, %v475_v44 }
 0x136   : > { %v501_v51 = vsel %vm481_vm4, %v473_v41, %v493_v47  ;;  %v505_v52 = vsel %vm485_vm5, %v477_v42, %v497_v48 }
 0x137   : > { %509 = vst [vmem:[%s1160_s22 + $0x18] sm:$0xff] %v501_v51  ;;  %513 = vst [vmem:[%s1160_s22 + $0x38] sm:$0xff] %v505_v52  ;;  %v499_v53 = vsel %vm479_vm6, %v471_v43, %v491_v49  ;;  %v503_v54 = vsel %vm483_vm7, %v475_v44, %v495_v50 }
 0x138   : > { %507 = vst [vmem:[%s1160_s22 + $0x8] sm:$0xff] %v499_v53  ;;  %511 = vst [vmem:[%s1160_s22 + $0x28] sm:$0xff] %v503_v54 }
 0x139   : > { %912 = shalt.err (!%p909_p2)
}
 0x13a   : > { %s913_s28 = scalar_lea.hbm %s1171_s8, 1024  ;;  %s917_s30 = scalar_lea.hbm %s1228_s3, 2048 }
 0x13b   : > { %p914_p9 = scmp.ne.s32.totalorder %s1171_s8, %s913_s28  ;;  %p918_p0 = scmp.lt.s32.totalorder %s1171_s8, %s1228_s3 }
 0x13c   : > { %p919_p7 = scmp.lt.s32.totalorder %s917_s30, %s913_s28 }
 0x13d   : > { %p915_p12 = pnand %p914_p9, %p1111_p3 }
 0x13e   : > { %p920_p5 = por %p919_p7, %p918_p0 }
 0x13f   : > { %p916_p13 = pneg %p915_p12 }
 0x141   : > { %p921_p1 = pnand %p920_p5, %p916_p13 }
 0x143   : > { %924 = shalt.err (!%p921_p1)
}
 0x144   : > { %s991_s22 = smov 128   ;;  %s992_s24 = smov 8  }
 0x145   : > { %730 = dma.vmem_to_hbm [thread:$0]  (%p1111_p3), %s1173_s5, 1024, %s1171_s8, %s515_s9, %s991_s22, %s991_s22, %s992_s24  }
 0x146 PF: > { %s543_s15 = sand.u32 1, %s963_s12   ;;  %p1239_p4 = scmp.ne.s32.totalorder %s1233_s23, 0 }
 0x147   : > { %p1240_p6 = scmp.ge.s32.totalorder %s983_s17, 2  ;;  %s544_s7 = scalar_lea.sflag [#allocation5], %s543_s15 }
 0x149   : > { %p744_p8 = pnand %p1240_p6, %p1239_p4 }
 0x14b   : > { %p745_p10 = pneg %p744_p8 }
 0x14d   : > { %958 = dma.done.wait (%p745_p10), %s544_s7, 1024  }
 0x14e   : > { %960 = vsyncadd (%p745_p10), %s544_s7, 4294966272  ;;  %s20_s17 = sadd.s32 1, %s983_s17   ;;  %s1241_s12 = smov %s967_s13 }
 0x14f   : > { %p17_p11 = scmp.ge.s32.totalorder %s20_s17, 4   ;;  %s1242_s13 = smov %s971_s14 }
 0x150   : > { %s1243_s14 = smov %s1120_s29  ;;  %s1244_s15 = smov %s979_s16 }
 0x151   : > { %s1245_s16 = smov %s1247_s11  ;;  %19 = sbr.rel (!%p17_p11) target bundleno = 7 (0x7), region = 94 }
 0x156   :  { %549 = vsyncpa [#allocation4], 1 }
 0x157   :  { %551 = vsyncpa [#allocation4 + $0x1], 1 }
 0x158   :  { %552 = vsyncpa [#allocation7], 1 }
 0x159   :  { %553 = vsyncpa [#allocation5], 1 }
 0x15a   :  { %555 = vsyncpa [#allocation5 + $0x1], 1 }

</bundles_post_ra>
